<compile_context>
chip_gen: v7x
topology: tpu7x:2x2x1
jax: 0.10.0
libtpu: 0.0.40
codegen_flags: <defaults>
</compile_context>

<pallas_src>
import functools

import jax
import jax.numpy as jnp
from jax import lax
from jax.experimental import pallas as pl
from jax.experimental.pallas import tpu as pltpu

LANES = 128
SUBLANES = 8                           # f32 sublanes per vreg
MAX_BLOCK_BYTES = 4 * 1024 * 1024      # ~4 MiB per input block (amortize ~0.35us/step)
STRIP_ROWS = 256                       # strip-mine the per-block fold (bound live vregs)
VMEM_LIMIT_BYTES = 32 * 1024 * 1024    # 2 inputs x 2 bufs x 4 MiB = 16 MiB + headroom

_SUPPORTED_LOSSES = ("MSELoss", "L1Loss")


@functools.lru_cache(maxsize=1)
def _num_core_splits():
    """2 on v7x (2 TensorCores per JAX device), else 1 (v2–v6 are 1 TC/device)."""
    try:
        kind = jax.devices()[0].device_kind.replace(" ", "").lower()
    except Exception:
        return 1
    # TODO(synk): on v7x verify the "parallel" grid axis actually shards across
    # both TensorCores (xprof); if not, switch that axis to pltpu.CORE_PARALLEL.
    return 2 if "7" in kind else 1


def _accum_block(pred_ref, tgt_ref, acc_ref, *, block_rows, row0=None, rows=None):
    """Accumulate sum((p-t)^2), sum(|p-t|) of one (block_rows, 128) tile onto the
    resident (2, 8, 128) f32 accumulator.  Strip-mined so each step's live set
    is a handful of vregs; the optional row mask is only emitted when needed."""

    def strip(local_off, nrows):
        p = pred_ref[pl.ds(local_off, nrows), :].astype(jnp.float32)
        t = tgt_ref[pl.ds(local_off, nrows), :].astype(jnp.float32)
        d = p - t
        if row0 is not None:
            # Boundary block: zero rows past the real data (OOB DMA region is
            # undefined, so it must be masked before squaring / abs).
            ids = local_off + lax.broadcasted_iota(jnp.int32, (nrows, LANES), 0)
            d = jnp.where(row0 + ids < rows, d, jnp.float32(0.0))
        folds = nrows // SUBLANES
        acc_ref[0] += (d * d).reshape(folds, SUBLANES, LANES).sum(axis=0)
        acc_ref[1] += jnp.abs(d).reshape(folds, SUBLANES, LANES).sum(axis=0)

    n_strips = block_rows // STRIP_ROWS
    rem = block_rows % STRIP_ROWS
    if n_strips:
        @pl.loop(0, n_strips)
        def _(s):
            strip(pl.multiple_of(s * STRIP_ROWS, STRIP_ROWS), STRIP_ROWS)
    if rem:
        strip(n_strips * STRIP_ROWS, rem)


def _multi_loss_kernel(pred_ref, tgt_ref, acc_ref, *,
                       rows, block_rows, blocks_per_core, needs_mask):
    """One grid step: accumulate partial sums of (p-t)^2 and |p-t|.

    pred_ref, tgt_ref : VMEM tiles of shape (block_rows, LANES)
    acc_ref           : resident VMEM output block (2, SUBLANES, LANES) f32
                        acc_ref[0] = running elementwise sum of squared diffs
                        acc_ref[1] = running elementwise sum of abs diffs
    """
    c = pl.program_id(0)   # core-split index ("parallel")
    j = pl.program_id(1)   # reduction step   ("arbitrary")

    @pl.when(j == 0)
    def _init():
        acc_ref[...] = jnp.zeros_like(acc_ref)

    if not needs_mask:
        # All blocks are full and evenly split: no mask work on any step.
        _accum_block(pred_ref, tgt_ref, acc_ref, block_rows=block_rows)
        return

    row0 = (c * blocks_per_core + j) * block_rows
    remaining = rows - row0

    @pl.when(remaining >= block_rows)                 # interior block: unmasked path
    def _full():
        _accum_block(pred_ref, tgt_ref, acc_ref, block_rows=block_rows)

    @pl.when(jnp.logical_and(remaining > 0, remaining < block_rows))
    def _boundary():                                  # single boundary block: row mask
        _accum_block(pred_ref, tgt_ref, acc_ref, block_rows=block_rows,
                     row0=row0, rows=rows)
    # remaining <= 0: clamped duplicate block on an idle core split -> contribute 0.


def _fused_mse_mae(pred, target):
    """Returns (mean squared error, mean absolute error) via one Pallas pass."""
    assert pred.shape == target.shape and pred.dtype == target.dtype
    n = pred.size
    p = pred.reshape(-1)
    t = target.reshape(-1)

    itemsize = jnp.dtype(pred.dtype).itemsize
    sub = SUBLANES * max(1, 4 // itemsize)      # dtype-native sublane packing (8/16/32)
    align = sub * LANES
    num_splits = _num_core_splits()

    # Aligned main body goes through Pallas; the (< align element) misaligned
    # tail is reduced by XLA inside the same jit -- no jnp.pad full-array copy.
    main = (n // align) * align
    sq_sum = jnp.float32(0.0)
    ab_sum = jnp.float32(0.0)

    if main:
        rows = main // LANES                    # multiple of `sub`
        max_block_rows = max(sub, (MAX_BLOCK_BYTES // (LANES * itemsize)) // sub * sub)
        block_rows = min(max_block_rows, rows)
        total_blocks = -(-rows // block_rows)
        blocks_per_core = -(-total_blocks // num_splits)
        needs_mask = (rows % block_rows != 0) or \
                     (blocks_per_core * num_splits != total_blocks)

        if main == n:
            p2, t2 = p.reshape(rows, LANES), t.reshape(rows, LANES)   # free view
        else:
            # Misaligned total size: prefix slice of the main body (XLA copy of
            # the main body only; no pad writes, tail stays out of the kernel).
            p2 = p[:main].reshape(rows, LANES)
            t2 = t[:main].reshape(rows, LANES)

        def in_map(c, j):
            # Clamp so a core-split with no real block re-reads the last block;
            # its contribution is skipped by the in-kernel `remaining <= 0` case.
            blk = jnp.minimum(c * blocks_per_core + j, total_blocks - 1)
            return (blk, 0)

        kernel = functools.partial(
            _multi_loss_kernel,
            rows=rows,
            block_rows=block_rows,
            blocks_per_core=blocks_per_core,
            needs_mask=needs_mask,
        )

        out = pl.pallas_call(
            kernel,
            out_shape=jax.ShapeDtypeStruct(
                (num_splits * 2, SUBLANES, LANES), jnp.float32),
            grid_spec=pltpu.PrefetchScalarGridSpec(
                num_scalar_prefetch=0,
                grid=(num_splits, blocks_per_core),
                in_specs=[
                    pl.BlockSpec((block_rows, LANES), in_map),
                    pl.BlockSpec((block_rows, LANES), in_map),
                ],
                out_specs=pl.BlockSpec((2, SUBLANES, LANES),
                                       lambda c, j: (c, 0, 0)),
            ),
            compiler_params=pltpu.CompilerParams(
                dimension_semantics=("parallel", "arbitrary"),
                vmem_limit_bytes=VMEM_LIMIT_BYTES,
            ),
            cost_estimate=pl.CostEstimate(
                flops=5 * main,
                transcendentals=0,
                bytes_accessed=2 * main * itemsize
                               + num_splits * 2 * SUBLANES * LANES * 4),
        )(p2, t2)

        # Tiny final reduction (num_splits*2*8*128 floats) by XLA inside the jit.
        sums = out.reshape(num_splits, 2, SUBLANES, LANES).sum(axis=(0, 2, 3))
        sq_sum = sq_sum + sums[0]
        ab_sum = ab_sum + sums[1]

    tail = n - main
    if tail:
        dt = p[main:].astype(jnp.float32) - t[main:].astype(jnp.float32)
        sq_sum = sq_sum + jnp.sum(dt * dt)
        ab_sum = ab_sum + jnp.sum(jnp.abs(dt))

    inv_n = jnp.float32(1.0 / n)
    return sq_sum * inv_n, ab_sum * inv_n


@functools.partial(jax.jit, static_argnames=("types",))
def _multi_loss_forward(pred, target, weights, types):
    mse, mae = _fused_mse_mae(pred, target)
    base = {"MSELoss": mse, "L1Loss": mae}
    per_loss = jnp.stack([base[t] for t in types]) * weights
    tot_loss = per_loss.sum()
    return tot_loss, per_loss


class MultiLossPallas:
    """JAX/Pallas port of MultiLoss with a deterministic synthetic loss config."""

    # TODO(synk): the PyTorch module builds arbitrary registry losses via
    # OPENOCC_LOSS.build(cfg); only MSELoss / L1Loss are implemented here.

    def __init__(self, loss_cfgs):
        assert isinstance(loss_cfgs, list)
        self.num_losses = len(loss_cfgs)
        self.loss_cfgs = loss_cfgs  # [{'type': ..., 'weight': ...}, ...]
        types, weights = [], []
        for cfg in loss_cfgs:
            assert cfg["type"] in _SUPPORTED_LOSSES, cfg
            types.append(cfg["type"])
            weights.append(float(cfg.get("weight", 1.0)))
        self._types = tuple(types)
        self._weights = jnp.asarray(weights, dtype=jnp.float32)

    def forward(self, inputs):
        pred = inputs["pred"]
        target = inputs["target"]
        tot_loss, per_loss = _multi_loss_forward(
            pred, target, self._weights, self._types)
        # mirrors [loss.detach().cpu().item() ...] — one batched host readback
        loss_list = [float(v) for v in jax.device_get(per_loss)]
        return tot_loss, loss_list

    __call__ = forward


if __name__ == "__main__":
    key = jax.random.PRNGKey(0)
    k1, k2 = jax.random.split(key)
    B, C, H, W = 2, 4, 16, 16  # NCHW
    pred = jax.random.normal(k1, (B, C, H, W), dtype=jnp.float32)
    target = jax.random.normal(k2, (B, C, H, W), dtype=jnp.float32)
    inputs = {"pred": pred, "target": target}

    loss_cfgs = [
        {"type": "MSELoss", "weight": 1.0},
        {"type": "L1Loss", "weight": 0.5},
    ]
    multi_loss = MultiLossPallas(loss_cfgs)

    tot_loss, loss_list = multi_loss(inputs)
    tot_loss = jax.block_until_ready(tot_loss)

    # reference check in plain JAX
    ref_mse = jnp.mean((pred - target) ** 2)
    ref_mae = jnp.mean(jnp.abs(pred - target))
    ref_tot = 1.0 * ref_mse + 0.5 * ref_mae
    assert jnp.allclose(tot_loss, ref_tot, rtol=1e-5, atol=1e-5), (tot_loss, ref_tot)
    assert abs(loss_list[0] - float(ref_mse)) < 1e-4
    assert abs(loss_list[1] - 0.5 * float(ref_mae)) < 1e-4

    print("KERNEL_OK")
</pallas_src>

<mosaic_0001>
module attributes {stable_mosaic.version = 11 : i64} {
  func.func @_multi_loss_kernel(%arg0: i32, %arg1: i32, %arg2: memref<16x128xf32, #tpu.memory_space<vmem>>, %arg3: memref<16x128xf32, #tpu.memory_space<vmem>>, %arg4: memref<2x8x128xf32, #tpu.memory_space<vmem>>) attributes {dimension_semantics = [#tpu.dimension_semantics<parallel>, #tpu.dimension_semantics<arbitrary>], iteration_bounds = array<i64: 1, 1>, scalar_prefetch = 0 : i64, scratch_operands = 0 : i64, tpu.core_type = #tpu.core_type<tc>, window_params = [{transform_indices = @transform_0, window_bounds = array<i64: 16, 128>}, {transform_indices = @transform_1, window_bounds = array<i64: 16, 128>}, {transform_indices = @transform_2, window_bounds = array<i64: 2, 8, 128>}]} {
    %c0_i32 = arith.constant 0 : i32
    %0 = arith.cmpi eq, %arg1, %c0_i32 : i32
    %1 = arith.extui %0 : i1 to i32
    %c0_i32_0 = arith.constant 0 : i32
    %2 = arith.cmpi ne, %1, %c0_i32_0 : i32
    scf.if %2 {
      %cst_16 = arith.constant 0.000000e+00 : f32
      %24 = vector.broadcast %cst_16 : f32 to vector<2x8x128xf32>
      %c0_17 = arith.constant 0 : index
      %c0_18 = arith.constant 0 : index
      %c0_19 = arith.constant 0 : index
      %25 = vector.load %arg4[%c0_17, %c0_18, %c0_19] : memref<2x8x128xf32, #tpu.memory_space<vmem>>, vector<2x8x128xf32>
      tpu.vector_store %arg4[%c0_17, %c0_18, %c0_19], %24 {strides = array<i32>} : memref<2x8x128xf32, #tpu.memory_space<vmem>>, vector<2x8x128xf32>,
    } else {
    }
    %c0 = arith.constant 0 : index
    %c0_1 = arith.constant 0 : index
    %3 = vector.load %arg2[%c0, %c0_1] : memref<16x128xf32, #tpu.memory_space<vmem>>, vector<16x128xf32>
    %c0_2 = arith.constant 0 : index
    %c0_3 = arith.constant 0 : index
    %4 = vector.load %arg3[%c0_2, %c0_3] : memref<16x128xf32, #tpu.memory_space<vmem>>, vector<16x128xf32>
    %5 = arith.subf %3, %4 : vector<16x128xf32>
    %c0_4 = arith.constant 0 : index
    %c0_5 = arith.constant 0 : index
    %c0_6 = arith.constant 0 : index
    %6 = vector.load %arg4[%c0_4, %c0_5, %c0_6] : memref<2x8x128xf32, #tpu.memory_space<vmem>>, vector<1x8x128xf32>
    %7 = vector.shape_cast %6 : vector<1x8x128xf32> to vector<8x128xf32>
    %8 = arith.mulf %5, %5 : vector<16x128xf32>
    %9 = vector.shape_cast %8 : vector<16x128xf32> to vector<2x8x128xf32>
    %cst = arith.constant dense<0.000000e+00> : vector<8x128xf32>
    %10 = vector.multi_reduction <add>, %9, %cst [0] : vector<2x8x128xf32> to vector<8x128xf32>
    %11 = arith.addf %7, %10 : vector<8x128xf32>
    %c0_7 = arith.constant 0 : index
    %c0_8 = arith.constant 0 : index
    %c0_9 = arith.constant 0 : index
    %12 = vector.load %arg4[%c0_7, %c0_8, %c0_9] : memref<2x8x128xf32, #tpu.memory_space<vmem>>, vector<1x8x128xf32>
    %13 = vector.shape_cast %12 : vector<1x8x128xf32> to vector<8x128xf32>
    %14 = vector.shape_cast %11 : vector<8x128xf32> to vector<1x8x128xf32>
    tpu.vector_store %arg4[%c0_7, %c0_8, %c0_9], %14 {strides = array<i32>} : memref<2x8x128xf32, #tpu.memory_space<vmem>>, vector<1x8x128xf32>,
    %c1 = arith.constant 1 : index
    %c0_10 = arith.constant 0 : index
    %c0_11 = arith.constant 0 : index
    %15 = vector.load %arg4[%c1, %c0_10, %c0_11] : memref<2x8x128xf32, #tpu.memory_space<vmem>>, vector<1x8x128xf32>
    %16 = vector.shape_cast %15 : vector<1x8x128xf32> to vector<8x128xf32>
    %17 = math.absf %5 : vector<16x128xf32>
    %18 = vector.shape_cast %17 : vector<16x128xf32> to vector<2x8x128xf32>
    %cst_12 = arith.constant dense<0.000000e+00> : vector<8x128xf32>
    %19 = vector.multi_reduction <add>, %18, %cst_12 [0] : vector<2x8x128xf32> to vector<8x128xf32>
    %20 = arith.addf %16, %19 : vector<8x128xf32>
    %c1_13 = arith.constant 1 : index
    %c0_14 = arith.constant 0 : index
    %c0_15 = arith.constant 0 : index
    %21 = vector.load %arg4[%c1_13, %c0_14, %c0_15] : memref<2x8x128xf32, #tpu.memory_space<vmem>>, vector<1x8x128xf32>
    %22 = vector.shape_cast %21 : vector<1x8x128xf32> to vector<8x128xf32>
    %23 = vector.shape_cast %20 : vector<8x128xf32> to vector<1x8x128xf32>
    tpu.vector_store %arg4[%c1_13, %c0_14, %c0_15], %23 {strides = array<i32>} : memref<2x8x128xf32, #tpu.memory_space<vmem>>, vector<1x8x128xf32>,
    return
  }
  func.func @transform_0(%arg0: i32, %arg1: i32) -> (i32, i32) {
    %c1_i32 = arith.constant 1 : i32
    %0 = arith.muli %arg0, %c1_i32 : i32
    %1 = arith.addi %0, %arg1 : i32
    %c0_i32 = arith.constant 0 : i32
    %2 = arith.minsi %1, %c0_i32 : i32
    %c0_i32_0 = arith.constant 0 : i32
    %c0_i32_1 = arith.constant 0 : i32
    return %2, %c0_i32_0 : i32, i32
  }
  func.func @transform_1(%arg0: i32, %arg1: i32) -> (i32, i32) {
    %c1_i32 = arith.constant 1 : i32
    %0 = arith.muli %arg0, %c1_i32 : i32
    %1 = arith.addi %0, %arg1 : i32
    %c0_i32 = arith.constant 0 : i32
    %2 = arith.minsi %1, %c0_i32 : i32
    %c0_i32_0 = arith.constant 0 : i32
    %c0_i32_1 = arith.constant 0 : i32
    return %2, %c0_i32_0 : i32, i32
  }
  func.func @transform_2(%arg0: i32, %arg1: i32) -> (i32, i32, i32) {
    %c0_i32 = arith.constant 0 : i32
    %c0_i32_0 = arith.constant 0 : i32
    %c0_i32_1 = arith.constant 0 : i32
    return %arg0, %c0_i32, %c0_i32_0 : i32, i32, i32
  }
}

</mosaic_0001>

<bundles_post_ra>
// kernel: _multi_loss_forward.1
= control target key start
LH: loop header
LB: loop body
LE: loop exit
PB: predicated region body
PF: predicated region fallthrough
CT: control target
= control target key end

     0   :  { %s152_s0 = inlined_call_operand.vmem [shape: f32[16,128], index: 0, kind: input, shape index: {}]   ;;  %s153_s1 = inlined_call_operand.vmem [shape: f32[16,128], index: 1, kind: input, shape index: {}]   ;;  %s154_s2 = inlined_call_operand.vmem [shape: f32[2,8,128], index: 2, kind: output, shape index: {}]  }
   0x1   :  { %v81_v0 = vld [vmem:[%s152_s0] sm:$0xff]  ;;  %v82_v1 = vld [vmem:[%s152_s0 + $0x8] sm:$0xff] }
   0x2   :  { %v83_v2 = vld [vmem:[%s153_s1] sm:$0xff]  ;;  %v84_v3 = vld [vmem:[%s153_s1 + $0x8] sm:$0xff] }
   0x3   :  { %v85_v4 = vsub.f32 %v81_v0, %v83_v2  ;;  %v86_v5 = vsub.f32 %v82_v1, %v84_v3 }
   0x5   :  { %v88_v6 = vmul.f32 %v85_v4, %v85_v4  ;;  %v95_v7 = vand.u32 2147483647, %v85_v4  ;;  %v89_v8 = vmul.f32 %v86_v5, %v86_v5  ;;  %v96_v9 = vand.u32 2147483647, %v86_v5 }
   0x7   :  { %v90_v10 = vadd.f32 %v89_v8, %v88_v6  ;;  %v97_v11 = vadd.f32 %v96_v9, %v95_v7 }
   0x9   :  { %92 = vst [vmem:[%s154_s2] sm:$0xff] %v90_v10  ;;  %117 = vst [vmem:[%s154_s2 + $0x8] sm:$0xff] %v97_v11 }

</bundles_post_ra>
